<compile_context>
chip_gen: v7x
topology: tpu7x:2x2x1
jax: 0.10.0
libtpu: 0.0.40
codegen_flags: <defaults>
</compile_context>

<pallas_src>
import math
import jax
import jax.numpy as jnp
from jax.experimental import pallas as pl
from jax.experimental.pallas import tpu as pltpu


_SUBLANE = 8  # f32 sublane tile


def _silu(x):
    # x * sigmoid(x); exp lands on the EUP slot, reciprocal is an approx vrcp
    # (also EUP) instead of a VPU divide sequence.
    return x * pl.reciprocal(1.0 + jnp.exp(-x), approx=True)


def _diffusion_embedding_kernel(side_ref, table_ref, w1_ref, b1_ref,
                                w2_ref, b2_ref, o_ref):
    # side_ref:  (B_pad, 4) f32   columns = [low_idx, high_idx, frac, 0]
    # table_ref: (max_steps, 128) bf16
    # w1_ref:    (128, 512) bf16,  b1_ref: (1, 512) f32
    # w2_ref:    (512, 512) bf16,  b2_ref: (1, 512) f32
    # o_ref:     (B_pad, 512) f32
    b = side_ref.shape[0]
    n_steps = table_ref.shape[0]

    side = side_ref[...]                        # (B_pad, 4) f32
    low = side[:, 0:1].astype(jnp.int32)        # (B_pad, 1)
    high = side[:, 1:2].astype(jnp.int32)       # (B_pad, 1)
    frac = side[:, 2:3]                         # (B_pad, 1) f32

    # Embedding gather as one-hot MXU matmuls (covers both the int and the lerp
    # path, no data-dependent indexing needed).  frac == 0 on the integer path.
    table = table_ref[...]                                        # bf16
    iota = jax.lax.broadcasted_iota(jnp.int32, (b, n_steps), 1)
    oh_low = (iota == low).astype(table.dtype)
    oh_high = (iota == high).astype(table.dtype)
    x_low = jnp.dot(oh_low, table, preferred_element_type=jnp.float32)
    x_high = jnp.dot(oh_high, table, preferred_element_type=jnp.float32)
    x = x_low + (x_high - x_low) * frac                           # f32 (B_pad,128)

    # projection1 + SiLU, projection2 + SiLU (lane-dense 512-wide outputs,
    # bf16 MXU operands, f32 accumulation).
    h = jnp.dot(x.astype(w1_ref.dtype), w1_ref[...],
                preferred_element_type=jnp.float32) + b1_ref[...]
    h = _silu(h)
    y = jnp.dot(h.astype(w2_ref.dtype), w2_ref[...],
                preferred_element_type=jnp.float32) + b2_ref[...]
    o_ref[...] = _silu(y).astype(o_ref.dtype)


def prepare_params(embedding, w1, b1, w2, b2, param_dtype=jnp.bfloat16):
    """One-time parameter prep, hoisted out of the per-call hot path.

    PyTorch Linear stores weight as (out, in); transpose to (in, out) so every
    matmul output is lane-dense, and cast the large operands to bf16.
    """
    table = embedding.astype(param_dtype)                 # (max_steps, 128)
    w1_t = jnp.transpose(w1).astype(param_dtype)          # (128, 512)
    w2_t = jnp.transpose(w2).astype(param_dtype)          # (512, 512)
    b1_r = b1.reshape(1, -1).astype(jnp.float32)          # (1, 512)
    b2_r = b2.reshape(1, -1).astype(jnp.float32)          # (1, 512)
    return table, w1_t, b1_r, w2_t, b2_r


def diffusion_embedding_forward(diffusion_step, table, w1_t, b1_r, w2_t, b2_r):
    """Pallas implementation of DiffusionEmbedding.forward.

    diffusion_step: (B,) int (table lookup) or float (lerp between rows)
    table/w1_t/b1_r/w2_t/b2_r: output of prepare_params().
    """
    n_steps, emb_dim = table.shape
    hidden = w1_t.shape[1]
    out_dim = w2_t.shape[1]
    bsz = diffusion_step.shape[0]

    # Host/glue side of the dtype dispatch in forward().  Indices are clamped
    # (PyTorch would raise on genuinely out-of-range steps).
    if jnp.issubdtype(diffusion_step.dtype, jnp.integer):
        low = jnp.clip(diffusion_step.astype(jnp.int32), 0, n_steps - 1)
        high = low
        frac = jnp.zeros((bsz,), jnp.float32)
    else:
        t = diffusion_step.astype(jnp.float32)
        low_f = jnp.floor(t)
        low = jnp.clip(low_f.astype(jnp.int32), 0, n_steps - 1)
        high = jnp.clip(jnp.ceil(t).astype(jnp.int32), 0, n_steps - 1)
        frac = t - low_f

    # Pack the three tiny side inputs into a single array padded to a full
    # 8-row sublane tile: one DMA, full vregs, unmasked output stores.
    b_pad = max(_SUBLANE, ((bsz + _SUBLANE - 1) // _SUBLANE) * _SUBLANE)
    side = jnp.zeros((b_pad, 4), jnp.float32)
    side = side.at[:bsz, 0].set(low.astype(jnp.float32))
    side = side.at[:bsz, 1].set(high.astype(jnp.float32))
    side = side.at[:bsz, 2].set(frac)

    out = pl.pallas_call(
        _diffusion_embedding_kernel,
        out_shape=jax.ShapeDtypeStruct((b_pad, out_dim), jnp.float32),
        grid_spec=pltpu.PrefetchScalarGridSpec(
            num_scalar_prefetch=0,
            grid=(1,),                                   # whole forward in one step
            in_specs=[
                pl.BlockSpec((b_pad, 4), lambda i: (0, 0)),            # packed side inputs
                pl.BlockSpec((n_steps, emb_dim), lambda i: (0, 0)),    # embedding table (bf16)
                pl.BlockSpec((emb_dim, hidden), lambda i: (0, 0)),     # W1^T (bf16)
                pl.BlockSpec((1, hidden), lambda i: (0, 0)),           # b1 (f32)
                pl.BlockSpec((hidden, out_dim), lambda i: (0, 0)),     # W2^T (bf16)
                pl.BlockSpec((1, out_dim), lambda i: (0, 0)),          # b2 (f32)
            ],
            out_specs=pl.BlockSpec((b_pad, out_dim), lambda i: (0, 0)),
        ),
        compiler_params=pltpu.CompilerParams(
            dimension_semantics=("arbitrary",)),
    )(side, table, w1_t, b1_r, w2_t, b2_r)
    return out[:bsz]


def build_embedding(max_steps):
    # Mirrors DiffusionEmbedding._build_embedding.
    steps = jnp.arange(max_steps, dtype=jnp.float32)[:, None]      # (T, 1)
    dims = jnp.arange(64, dtype=jnp.float32)[None, :]              # (1, 64)
    table = steps * 10.0 ** (dims * 4.0 / 63.0)
    return jnp.concatenate([jnp.sin(table), jnp.cos(table)], axis=1)  # (T, 128)


if __name__ == "__main__":
    max_steps = 50
    emb_dim, hidden = 128, 512
    B = 2

    key = jax.random.PRNGKey(0)
    k1, k2, k3, k4 = jax.random.split(key, 4)

    embedding = build_embedding(max_steps)

    # Deterministic params mirroring nn.Linear default init: U(+-1/sqrt(fan_in)).
    bound1 = 1.0 / math.sqrt(emb_dim)
    w1 = jax.random.uniform(k1, (hidden, emb_dim), jnp.float32, -bound1, bound1)
    b1 = jax.random.uniform(k2, (hidden,), jnp.float32, -bound1, bound1)
    bound2 = 1.0 / math.sqrt(hidden)
    w2 = jax.random.uniform(k3, (hidden, hidden), jnp.float32, -bound2, bound2)
    b2 = jax.random.uniform(k4, (hidden,), jnp.float32, -bound2, bound2)

    # One-time parameter prep (transpose / bf16 cast) -- NOT in the hot path.
    params = prepare_params(embedding, w1, b1, w2, b2)
    params = jax.tree_util.tree_map(jax.block_until_ready, params)

    # Integer diffusion steps (embedding-lookup path).
    step_int = jnp.array([3, 41], dtype=jnp.int32)
    out_int = jax.block_until_ready(
        diffusion_embedding_forward(step_int, *params))

    # Float diffusion steps (lerp path).
    step_flt = jnp.array([3.25, 17.75], dtype=jnp.float32)
    out_flt = jax.block_until_ready(
        diffusion_embedding_forward(step_flt, *params))

    # Pure-JAX f32 reference of the PyTorch forward.
    def ref_forward(step):
        if jnp.issubdtype(step.dtype, jnp.integer):
            x = embedding[step]
        else:
            lo = jnp.floor(step).astype(jnp.int32)
            hi = jnp.ceil(step).astype(jnp.int32)
            x = embedding[lo] + (embedding[hi] - embedding[lo]) * (step - lo)[:, None]
        h = x @ w1.T + b1
        h = h * jax.nn.sigmoid(h)
        y = h @ w2.T + b2
        return y * jax.nn.sigmoid(y)

    ref_int = ref_forward(step_int)
    ref_flt = ref_forward(step_flt)

    assert out_int.shape == (B, hidden) and out_flt.shape == (B, hidden)
    # Tolerance accounts for bf16 weight/activation storage (f32 accumulation)
    # and MXU vs XLA f32 matmul differences.
    assert jnp.allclose(out_int, ref_int, atol=3e-2, rtol=3e-2)
    assert jnp.allclose(out_flt, ref_flt, atol=3e-2, rtol=3e-2)

    print("KERNEL_OK")
</pallas_src>

<mosaic_0001>
module attributes {stable_mosaic.version = 11 : i64} {
  func.func @_diffusion_embedding_kernel(%arg0: i32, %arg1: memref<8x4xf32, #tpu.memory_space<vmem>>, %arg2: memref<50x128xbf16, #tpu.memory_space<vmem>>, %arg3: memref<128x512xbf16, #tpu.memory_space<vmem>>, %arg4: memref<1x512xf32, #tpu.memory_space<vmem>>, %arg5: memref<512x512xbf16, #tpu.memory_space<vmem>>, %arg6: memref<1x512xf32, #tpu.memory_space<vmem>>, %arg7: memref<8x512xf32, #tpu.memory_space<vmem>>) attributes {dimension_semantics = [#tpu.dimension_semantics<arbitrary>], iteration_bounds = array<i64: 1>, scalar_prefetch = 0 : i64, scratch_operands = 0 : i64, tpu.core_type = #tpu.core_type<tc>, window_params = [{pipeline_mode = #tpu.pipeline_mode<synchronous>, transform_indices = @transform_0, window_bounds = array<i64: 8, 4>}, {pipeline_mode = #tpu.pipeline_mode<synchronous>, transform_indices = @transform_1, window_bounds = array<i64: 50, 128>}, {pipeline_mode = #tpu.pipeline_mode<synchronous>, transform_indices = @transform_2, window_bounds = array<i64: 128, 512>}, {pipeline_mode = #tpu.pipeline_mode<synchronous>, transform_indices = @transform_3, window_bounds = array<i64: 1, 512>}, {pipeline_mode = #tpu.pipeline_mode<synchronous>, transform_indices = @transform_4, window_bounds = array<i64: 512, 512>}, {pipeline_mode = #tpu.pipeline_mode<synchronous>, transform_indices = @transform_5, window_bounds = array<i64: 1, 512>}, {pipeline_mode = #tpu.pipeline_mode<synchronous>, transform_indices = @transform_6, window_bounds = array<i64: 8, 512>}]} {
    %c0 = arith.constant 0 : index
    %c0_0 = arith.constant 0 : index
    %0 = vector.load %arg1[%c0, %c0_0] : memref<8x4xf32, #tpu.memory_space<vmem>>, vector<8x4xf32>
    %1 = vector.extract_strided_slice %0 {offsets = [0, 0], sizes = [8, 1], strides = [1, 1]} : vector<8x4xf32> to vector<8x1xf32>
    %2 = arith.fptosi %1 : vector<8x1xf32> to vector<8x1xi32>
    %3 = vector.extract_strided_slice %0 {offsets = [0, 1], sizes = [8, 1], strides = [1, 1]} : vector<8x4xf32> to vector<8x1xf32>
    %4 = arith.fptosi %3 : vector<8x1xf32> to vector<8x1xi32>
    %5 = vector.extract_strided_slice %0 {offsets = [0, 2], sizes = [8, 1], strides = [1, 1]} : vector<8x4xf32> to vector<8x1xf32>
    %c0_1 = arith.constant 0 : index
    %c0_2 = arith.constant 0 : index
    %6 = vector.load %arg2[%c0_1, %c0_2] : memref<50x128xbf16, #tpu.memory_space<vmem>>, vector<50x128xbf16>
    %7 = tpu.iota {dimensions = array<i32: 1>} : vector<8x50xi32>
    %8 = vector.broadcast %2 : vector<8x1xi32> to vector<8x50xi32>
    %9 = arith.cmpi eq, %7, %8 : vector<8x50xi32>
    %10 = arith.extui %9 : vector<8x50xi1> to vector<8x50xi32>
    %11 = arith.sitofp %10 : vector<8x50xi32> to vector<8x50xf32>
    %12 = arith.truncf %11 : vector<8x50xf32> to vector<8x50xbf16>
    %13 = vector.broadcast %4 : vector<8x1xi32> to vector<8x50xi32>
    %14 = arith.cmpi eq, %7, %13 : vector<8x50xi32>
    %15 = arith.extui %14 : vector<8x50xi1> to vector<8x50xi32>
    %16 = arith.sitofp %15 : vector<8x50xi32> to vector<8x50xf32>
    %17 = arith.truncf %16 : vector<8x50xf32> to vector<8x50xbf16>
    %cst = arith.constant dense<0.000000e+00> : vector<8x128xf32>
    %18 = tpu.matmul %12, %6, %cst {dimension_numbers = #tpu.dot_dimension_numbers<[1], [0], [0], [1], [0, 0, 1, 1], [], []>} : vector<8x50xbf16>, vector<50x128xbf16>, vector<8x128xf32> -> vector<8x128xf32>
    %cst_3 = arith.constant dense<0.000000e+00> : vector<8x128xf32>
    %19 = tpu.matmul %17, %6, %cst_3 {dimension_numbers = #tpu.dot_dimension_numbers<[1], [0], [0], [1], [0, 0, 1, 1], [], []>} : vector<8x50xbf16>, vector<50x128xbf16>, vector<8x128xf32> -> vector<8x128xf32>
    %20 = arith.subf %19, %18 : vector<8x128xf32>
    %21 = vector.broadcast %5 : vector<8x1xf32> to vector<8x128xf32>
    %22 = arith.mulf %20, %21 : vector<8x128xf32>
    %23 = arith.addf %18, %22 : vector<8x128xf32>
    %24 = arith.truncf %23 : vector<8x128xf32> to vector<8x128xbf16>
    %c0_4 = arith.constant 0 : index
    %c0_5 = arith.constant 0 : index
    %25 = vector.load %arg3[%c0_4, %c0_5] : memref<128x512xbf16, #tpu.memory_space<vmem>>, vector<128x512xbf16>
    %cst_6 = arith.constant dense<0.000000e+00> : vector<8x512xf32>
    %26 = tpu.matmul %24, %25, %cst_6 {dimension_numbers = #tpu.dot_dimension_numbers<[1], [0], [0], [1], [0, 0, 1, 1], [], []>} : vector<8x128xbf16>, vector<128x512xbf16>, vector<8x512xf32> -> vector<8x512xf32>
    %c0_7 = arith.constant 0 : index
    %c0_8 = arith.constant 0 : index
    %27 = vector.load %arg4[%c0_7, %c0_8] : memref<1x512xf32, #tpu.memory_space<vmem>>, vector<1x512xf32>
    %28 = vector.broadcast %27 : vector<1x512xf32> to vector<8x512xf32>
    %29 = arith.addf %26, %28 : vector<8x512xf32>
    %cst_9 = arith.constant 0.000000e+00 : f32
    %30 = vector.broadcast %cst_9 : f32 to vector<8x512xf32>
    %31 = arith.subf %30, %29 : vector<8x512xf32>
    %32 = math.exp %31 : vector<8x512xf32>
    %cst_10 = arith.constant 1.000000e+00 : f32
    %33 = vector.broadcast %cst_10 : f32 to vector<8x512xf32>
    %34 = arith.addf %33, %32 : vector<8x512xf32>
    %35 = tpu.reciprocal %34 {approx = true} : vector<8x512xf32> -> vector<8x512xf32>
    %36 = arith.mulf %29, %35 : vector<8x512xf32>
    %37 = arith.truncf %36 : vector<8x512xf32> to vector<8x512xbf16>
    %c0_11 = arith.constant 0 : index
    %c0_12 = arith.constant 0 : index
    %38 = vector.load %arg5[%c0_11, %c0_12] : memref<512x512xbf16, #tpu.memory_space<vmem>>, vector<512x512xbf16>
    %cst_13 = arith.constant dense<0.000000e+00> : vector<8x512xf32>
    %39 = tpu.matmul %37, %38, %cst_13 {dimension_numbers = #tpu.dot_dimension_numbers<[1], [0], [0], [1], [0, 0, 1, 1], [], []>} : vector<8x512xbf16>, vector<512x512xbf16>, vector<8x512xf32> -> vector<8x512xf32>
    %c0_14 = arith.constant 0 : index
    %c0_15 = arith.constant 0 : index
    %40 = vector.load %arg6[%c0_14, %c0_15] : memref<1x512xf32, #tpu.memory_space<vmem>>, vector<1x512xf32>
    %41 = vector.broadcast %40 : vector<1x512xf32> to vector<8x512xf32>
    %42 = arith.addf %39, %41 : vector<8x512xf32>
    %cst_16 = arith.constant 0.000000e+00 : f32
    %43 = vector.broadcast %cst_16 : f32 to vector<8x512xf32>
    %44 = arith.subf %43, %42 : vector<8x512xf32>
    %45 = math.exp %44 : vector<8x512xf32>
    %cst_17 = arith.constant 1.000000e+00 : f32
    %46 = vector.broadcast %cst_17 : f32 to vector<8x512xf32>
    %47 = arith.addf %46, %45 : vector<8x512xf32>
    %48 = tpu.reciprocal %47 {approx = true} : vector<8x512xf32> -> vector<8x512xf32>
    %49 = arith.mulf %42, %48 : vector<8x512xf32>
    %c0_18 = arith.constant 0 : index
    %c0_19 = arith.constant 0 : index
    %50 = vector.load %arg7[%c0_18, %c0_19] : memref<8x512xf32, #tpu.memory_space<vmem>>, vector<8x512xf32>
    tpu.vector_store %arg7[%c0_18, %c0_19], %49 {strides = array<i32>} : memref<8x512xf32, #tpu.memory_space<vmem>>, vector<8x512xf32>,
    return
  }
  func.func @transform_0(%arg0: i32) -> (i32, i32) {
    %c0_i32 = arith.constant 0 : i32
    %c0_i32_0 = arith.constant 0 : i32
    %c0_i32_1 = arith.constant 0 : i32
    return %c0_i32, %c0_i32_0 : i32, i32
  }
  func.func @transform_1(%arg0: i32) -> (i32, i32) {
    %c0_i32 = arith.constant 0 : i32
    %c0_i32_0 = arith.constant 0 : i32
    %c0_i32_1 = arith.constant 0 : i32
    return %c0_i32, %c0_i32_0 : i32, i32
  }
  func.func @transform_2(%arg0: i32) -> (i32, i32) {
    %c0_i32 = arith.constant 0 : i32
    %c0_i32_0 = arith.constant 0 : i32
    %c0_i32_1 = arith.constant 0 : i32
    return %c0_i32, %c0_i32_0 : i32, i32
  }
  func.func @transform_3(%arg0: i32) -> (i32, i32) {
    %c0_i32 = arith.constant 0 : i32
    %c0_i32_0 = arith.constant 0 : i32
    %c0_i32_1 = arith.constant 0 : i32
    return %c0_i32, %c0_i32_0 : i32, i32
  }
  func.func @transform_4(%arg0: i32) -> (i32, i32) {
    %c0_i32 = arith.constant 0 : i32
    %c0_i32_0 = arith.constant 0 : i32
    %c0_i32_1 = arith.constant 0 : i32
    return %c0_i32, %c0_i32_0 : i32, i32
  }
  func.func @transform_5(%arg0: i32) -> (i32, i32) {
    %c0_i32 = arith.constant 0 : i32
    %c0_i32_0 = arith.constant 0 : i32
    %c0_i32_1 = arith.constant 0 : i32
    return %c0_i32, %c0_i32_0 : i32, i32
  }
  func.func @transform_6(%arg0: i32) -> (i32, i32) {
    %c0_i32 = arith.constant 0 : i32
    %c0_i32_0 = arith.constant 0 : i32
    %c0_i32_1 = arith.constant 0 : i32
    return %c0_i32, %c0_i32_0 : i32, i32
  }
}

</mosaic_0001>

<bundles_post_ra>
// kernel: tpu_custom_call.1
= control target key start
LH: loop header
LB: loop body
LE: loop exit
PB: predicated region body
PF: predicated region fallthrough
CT: control target
= control target key end

     0   :  { %11 = vsyncpa [#allocation3], 0  ;;  %s2290_s0 = inlined_call_operand.vmem [shape: f32[8,4], index: 0, kind: input, shape index: {}]   ;;  %s2291_s1 = inlined_call_operand.hbm [shape: bf16[50,128], index: 1, kind: input, shape index: {}]   ;;  %s2292_s2 = inlined_call_operand.hbm [shape: bf16[128,512], index: 2, kind: input, shape index: {}]   ;;  %s2293_s3 = inlined_call_operand.vmem [shape: f32[1,512], index: 3, kind: input, shape index: {}]   ;;  %s2294_s4 = inlined_call_operand.hbm [shape: bf16[512,512], index: 4, kind: input, shape index: {}]   ;;  %s2295_s5 = inlined_call_operand.vmem [shape: f32[1,512], index: 5, kind: input, shape index: {}]   ;;  %s2296_s6 = inlined_call_operand.hbm [shape: f32[8,512], index: 6, kind: output, shape index: {}]  }
   0x1   :  { %12 = vsyncpa [#allocation6], 0 }
   0x2   :  { %13 = vsyncpa [#allocation4], 0  ;;  %s2137_s21 = smov [#allocation5]   ;;  %s2043_s25 = scalar_lea.hbm %s2292_s2, 4096 }
   0x3   :  { %s33_s22 = sshll.u32 %s2137_s21, 4  ;;  %p2044_p0 = scmp.ne.s32.totalorder %s2292_s2, %s2043_s25  ;;  %s34_s22 = int_to_ptr.vmem [resolvable:$true] %s33_s22 }
   0x4   :  { %p2047_p1 = scmp.lt.u32.totalorder %s2043_s25, %s2292_s2 }
   0x6   :  { %p2049_p2 = pnand %p2047_p1, %p2044_p0 }
   0x8   :  { %2052 = shalt.err (!%p2049_p2)
}
   0x9   :  { %s2053_s30 = scalar_lea.vmem %s34_s22, 4096  ;;  %p2058_p4 = scmp.lt.s32.totalorder %s34_s22, %s34_s22 }
   0xa   :  { %p2054_p3 = scmp.ne.s32.totalorder %s34_s22, %s2053_s30  ;;  %p2059_p5 = scmp.lt.s32.totalorder %s2053_s30, %s2053_s30 }
   0xc   :  { %p2060_p6 = por %p2059_p5, %p2058_p4 }
   0xe   :  { %p2061_p7 = pnand %p2060_p6, %p2054_p3 }
  0x10   :  { %2064 = shalt.err (!%p2061_p7)
}
  0x11   :  { %s2138_s7 = smov 256   ;;  %s2139_s8 = smov 16  }
  0x12   :  { %39 = dma.hbm_to_vmem [thread:$0]  %s2292_s2, 4096, %s34_s22, [#allocation6], %s2138_s7, %s2138_s7, %s2139_s8  }
  0x13   :  { %s2140_s11 = smov [#allocation2]   ;;  %s2065_s15 = scalar_lea.hbm %s2291_s1, 448 }
  0x14   :  { %s21_s12 = sshll.u32 %s2140_s11, 4  ;;  %p2066_p8 = scmp.ne.s32.totalorder %s2291_s1, %s2065_s15  ;;  %s22_s12 = int_to_ptr.vmem [resolvable:$true] %s21_s12 }
  0x15   :  { %p2069_p9 = scmp.lt.u32.totalorder %s2065_s15, %s2291_s1 }
  0x17   :  { %p2071_p10 = pnand %p2069_p9, %p2066_p8 }
  0x19   :  { %2074 = shalt.err (!%p2071_p10)
}
  0x1a   :  { %s2075_s20 = scalar_lea.vmem %s22_s12, 448  ;;  %p2080_p12 = scmp.lt.s32.totalorder %s22_s12, %s22_s12 }
  0x1b   :  { %p2076_p11 = scmp.ne.s32.totalorder %s22_s12, %s2075_s20  ;;  %p2081_p13 = scmp.lt.s32.totalorder %s2075_s20, %s2075_s20 }
  0x1d   :  { %p2082_p0 = por %p2081_p13, %p2080_p12 }
  0x1f   :  { %p2083_p1 = pnand %p2082_p0, %p2076_p11 }
  0x21   :  { %2086 = shalt.err (!%p2083_p1)
}
  0x22   :  { %s2141_s2 = smov 64   ;;  %s2142_s21 = smov 4  }
  0x23   :  { %27 = dma.hbm_to_vmem [thread:$0]  %s2291_s1, 448, %s22_s12, [#allocation3], %s2141_s2, %s2141_s2, %s2142_s21  }
  0x24   :  { %s2143_s24 = smov [#allocation7]   ;;  %s2087_s28 = scalar_lea.hbm %s2294_s4, 16384 }
  0x25   :  { %s47_s25 = sshll.u32 %s2143_s24, 4  ;;  %p2088_p2 = scmp.ne.s32.totalorder %s2294_s4, %s2087_s28  ;;  %s48_s25 = int_to_ptr.vmem [resolvable:$true] %s47_s25 }
  0x26   :  { %p2091_p3 = scmp.lt.u32.totalorder %s2087_s28, %s2294_s4 }
  0x28   :  { %p2093_p4 = pnand %p2091_p3, %p2088_p2 }
  0x2a   :  { %2096 = shalt.err (!%p2093_p4)
}
  0x2b   :  { %s2097_s11 = scalar_lea.vmem %s48_s25, 16384  ;;  %p2102_p6 = scmp.lt.s32.totalorder %s48_s25, %s48_s25 }
  0x2c   :  { %p2098_p5 = scmp.ne.s32.totalorder %s48_s25, %s2097_s11  ;;  %p2103_p7 = scmp.lt.s32.totalorder %s2097_s11, %s2097_s11 }
  0x2e   :  { %p2104_p8 = por %p2103_p7, %p2102_p6 }
  0x30   :  { %p2105_p9 = pnand %p2104_p8, %p2098_p5 }
  0x32   :  { %2108 = shalt.err (!%p2105_p9)
}
  0x33   :  { %53 = dma.hbm_to_vmem [thread:$0]  %s2294_s4, 16384, %s48_s25, [#allocation6], %s2138_s7, %s2138_s7, %s2139_s8  }
  0x34   :  { %2131 = dma.done.wait [#allocation3], 448  }
  0x35   :  { %2132 = vsyncadd [#allocation3], 4294966848 }
  0x36   :  { %2133 = dma.done.wait [#allocation6], 20480  }
  0x37   :  { %2134 = vsyncadd [#allocation6], 4294946816  ;;  %v2144_v0 = vmov 0   ;;  %v2145_v1 = vmov 0.0   ;;  %v66_v2 = vld [vmem:[%s2290_s0] sm:$0xff]  ;;  %v1768_v6 = vld [vmem:[#allocation2 + $0x8] sm:$0xff]   ;;  %v75_v14 = vlaneseq }
  0x38   :  { %1763 = vset.pattern.permute.xlu0 %v2144_v0  ;;  %1712 = vmatprep.subr.bf16.mxu0 %v2145_v1  ;;  %v1748_v3 = vtrunc.f32 %v66_v2  ;;  %v1767_v4 = vld [vmem:[#allocation2] sm:$0xff]   ;;  %v1769_v7 = vld [vmem:[#allocation2 + $0x10] sm:$0xff]   ;;  %v1770_v8 = vld [vmem:[#allocation2 + $0x18] ss:$0 sps:$4 sm:$0x11]   ;;  %v2146_v9 = vmov 1  }
  0x39   :  { %1724 = vmatprep.subr.bf16.mxu1 %v2145_v1  ;;  %1713 = vmatpush3.bf16.msra.mxu0 %v1767_v4  ;;  %vm116_vm0 = vcmask 1040384   ;;  %vm2147_vm1 = vmmov 0   ;;  %v1773_v11 = vld [vmem:[#allocation5 + $0x4] ss:$16 sps:$4 sm:$0xff]   ;;  %v1776_v12 = vld [vmem:[#allocation5 + $0xc] ss:$16 sps:$4 sm:$0xff]  }
  0x3a   :  { %v1749_v5 = vcvt.f32.s32 %v1748_v3  ;;  %1725 = vmatpush3.bf16.msra.mxu1 %v1767_v4  ;;  %1714 = vmatprep.subr.bf16.mxu0 %v2145_v1  ;;  %v118_v10 = vsel %vm116_vm0, %v1770_v8, 0  ;;  %v2148_v13 = vmov 2   ;;  %v76_v15 = vand.u32 127, %v75_v14  ;;  %v1771_v18 = vld [vmem:[#allocation5] ss:$16 sps:$4 sm:$0xff]  }
  0x3b   :  { %1726 = vmatprep.subr.bf16.mxu1 %v2145_v1  ;;  %1720 = vmatprep.mubr.msk.bf16.mxu0 %vm2147_vm1, %v2145_v1  ;;  %vm112_vm3 = vcmask 408576   ;;  %v1779_v20 = vld [vmem:[#allocation5 + $0x24] ss:$16 sps:$4 sm:$0xff]   ;;  %v1777_v22 = vld [vmem:[#allocation5 + $0x20] ss:$16 sps:$4 sm:$0xff]  }
  0x3c   :  { %78 = vperm.xlu0 %1763, %v1749_v5   ;;  %1732 = vmatprep.mubr.msk.bf16.mxu1 %vm2147_vm1, %v2145_v1  ;;  %v1774_v24 = vld [vmem:[#allocation5 + $0x8] ss:$16 sps:$4 sm:$0xff]   ;;  %v1785_v25 = vld [vmem:[#allocation5 + $0x44] ss:$16 sps:$4 sm:$0xff]   ;;  %v1782_v27 = vld [vmem:[#allocation5 + $0x2c] ss:$16 sps:$4 sm:$0xff]  }
  0x3d   :  { %1715 = vmatpush3.bf16.msra.mxu0 %v1768_v6  ;;  %1765 = vset.pattern.permute.xlu1 %v2148_v13  ;;  %v1783_v28 = vld [vmem:[#allocation5 + $0x40] ss:$16 sps:$4 sm:$0xff]   ;;  %v1780_v29 = vld [vmem:[#allocation5 + $0x28] ss:$16 sps:$4 sm:$0xff]   ;;  %v1791_v30 = vld [vmem:[#allocation5 + $0x64] ss:$16 sps:$4 sm:$0xff]  }
  0x3e   :  { %1727 = vmatpush3.bf16.msra.mxu1 %v1768_v6  ;;  %1716 = vmatprep.subr.bf16.mxu0 %v2145_v1  ;;  %v1788_v31 = vld [vmem:[#allocation5 + $0x4c] ss:$16 sps:$4 sm:$0xff]   ;;  %v1789_v32 = vld [vmem:[#allocation5 + $0x60] ss:$16 sps:$4 sm:$0xff]   ;;  %v1786_v33 = vld [vmem:[#allocation5 + $0x48] ss:$16 sps:$4 sm:$0xff]  }
  0x3f   :  { %1728 = vmatprep.subr.bf16.mxu1 %v2145_v1  ;;  %206 = vperm.xlu1 %1765, %v66_v2   ;;  %v1797_v34 = vld [vmem:[#allocation5 + $0x84] ss:$16 sps:$4 sm:$0xff]   ;;  %v1794_v35 = vld [vmem:[#allocation5 + $0x6c] ss:$16 sps:$4 sm:$0xff]   ;;  %v1795_v36 = vld [vmem:[#allocation5 + $0x80] ss:$16 sps:$4 sm:$0xff]  }
  0x40   :  { %1764 = vset.pattern.permute.xlu0 %v2146_v9  ;;  %v1792_v37 = vld [vmem:[#allocation5 + $0x68] ss:$16 sps:$4 sm:$0xff]   ;;  %v1800_v38 = vld [vmem:[#allocation5 + $0x8c] ss:$16 sps:$4 sm:$0xff]   ;;  %v1803_v40 = vld [vmem:[#allocation5 + $0xa4] ss:$16 sps:$4 sm:$0xff]  }
  0x41   :  { %85 = vperm.xlu0 %1764, %v1749_v5   ;;  %1717 = vmatpush3.bf16.msra.mxu0 %v1769_v7  ;;  %v1798_v39 = vld [vmem:[#allocation5 + $0x88] ss:$16 sps:$4 sm:$0xff]   ;;  %v1806_v41 = vld [vmem:[#allocation5 + $0xac] ss:$16 sps:$4 sm:$0xff]   ;;  %v1801_v42 = vld [vmem:[#allocation5 + $0xa0] ss:$16 sps:$4 sm:$0xff]  }
  0x42   :  { %1729 = vmatpush3.bf16.msra.mxu1 %v1769_v7  ;;  %1718 = vmatprep.subr.bf16.mxu0 %v2145_v1  ;;  %v1804_v43 = vld [vmem:[#allocation5 + $0xa8] ss:$16 sps:$4 sm:$0xff]   ;;  %v1809_v44 = vld [vmem:[#allocation5 + $0xc4] ss:$16 sps:$4 sm:$0xff]   ;;  %v1812_v45 = vld [vmem:[#allocation5 + $0xcc] ss:$16 sps:$4 sm:$0xff]  }
  0x43   :  { %1730 = vmatprep.subr.bf16.mxu1 %v2145_v1  ;;  %v1807_v46 = vld [vmem:[#allocation5 + $0xc0] ss:$16 sps:$4 sm:$0xff]   ;;  %v1810_v47 = vld [vmem:[#allocation5 + $0xc8] ss:$16 sps:$4 sm:$0xff]   ;;  %v1815_v48 = vld [vmem:[#allocation5 + $0xe4] ss:$16 sps:$4 sm:$0xff]  }
  0x44   :  { %v1818_v49 = vld [vmem:[#allocation5 + $0xec] ss:$16 sps:$4 sm:$0xff]   ;;  %v1813_v50 = vld [vmem:[#allocation5 + $0xe0] ss:$16 sps:$4 sm:$0xff]   ;;  %v1816_v51 = vld [vmem:[#allocation5 + $0xe8] ss:$16 sps:$4 sm:$0xff]  }
  0x45   :  { %1719 = vmatpush3.bf16.msra.mxu0 %v118_v10  ;;  %1766 = vset.pattern.permute.xlu0 %v2148_v13  ;;  %v1821_v52 = vld [vmem:[#allocation7 + $0x4] ss:$16 sps:$4 sm:$0xff]   ;;  %v1824_v53 = vld [vmem:[#allocation7 + $0xc] ss:$16 sps:$4 sm:$0xff]   ;;  %v1819_v2 = vld [vmem:[#allocation7] ss:$16 sps:$4 sm:$0xff]  }
  0x46   :  { %1731 = vmatpush3.bf16.msra.mxu1 %v118_v10  ;;  %426 = vmatprep.subr.bf16.mxu0 %v1773_v11  ;;  %v1822_v3 = vld [vmem:[#allocation7 + $0x8] ss:$16 sps:$4 sm:$0xff]   ;;  %v1827_v5 = vld [vmem:[#allocation7 + $0x24] ss:$16 sps:$4 sm:$0xff]   ;;  %v1830_v6 = vld [vmem:[#allocation7 + $0x2c] ss:$16 sps:$4 sm:$0xff]  }
  0x47   :  { %467 = vmatprep.subr.bf16.mxu1 %v1776_v12  ;;  %v1825_v7 = vld [vmem:[#allocation7 + $0x20] ss:$16 sps:$4 sm:$0xff]   ;;  %v1828_v8 = vld [vmem:[#allocation7 + $0x28] ss:$16 sps:$4 sm:$0xff]   ;;  %v1833_v9 = vld [vmem:[#allocation7 + $0x44] ss:$16 sps:$4 sm:$0xff]  }
  0x48   :  { %v1836_v10 = vld [vmem:[#allocation7 + $0x4c] ss:$16 sps:$4 sm:$0xff]   ;;  %v1831_v11 = vld [vmem:[#allocation7 + $0x40] ss:$16 sps:$4 sm:$0xff]   ;;  %v1834_v12 = vld [vmem:[#allocation7 + $0x48] ss:$16 sps:$4 sm:$0xff]  }
  0x49   :  { %v1839_v13 = vld [vmem:[#allocation7 + $0x64] ss:$16 sps:$4 sm:$0xff]  }
  0xbb   :  { %v79_v16 = vpop.permute.xlu0 %78 }
  0xbc   :  { %vm80_vm2 = vcmp.eq.s32.totalorder %v76_v15, %v79_v16  ;;  %v1837_v16 = vld [vmem:[#allocation7 + $0x60] ss:$16 sps:$4 sm:$0xff]  }
  0xbd   :  { %v1534_v17 = vsel %vm80_vm2, 1.0, %v2145_v1 }
  0xbe   :  { %v83_v19 = vpack.c.bf16 %v1534_v17, %v1534_v17  ;;  %v207_v59 = vpop.permute.xlu1 %206  ;;  %v1840_v17 = vld [vmem:[#allocation7 + $0x68] ss:$16 sps:$4 sm:$0xff]  }
  0xc0   :  { %1721 = vmatmul.mubr.msk.bf16.vlgmr.msra.gmra.mrb[0].mxu0 %vm112_vm3, %v83_v19  ;;  %v86_v21 = vpop.permute.xlu0 %85  ;;  %v1848_v19 = vld [vmem:[#allocation7 + $0x8c] ss:$16 sps:$4 sm:$0xff]  }
  0xc1   :  { %vm87_vm4 = vcmp.eq.s32.totalorder %v76_v15, %v86_v21  ;;  %427 = vmatpush1.bf16.msra.mxu0 %v1771_v18  ;;  %458 = vmatprep.mubr.bf16.mxu0 %v2144_v0  ;;  %v1842_v15 = vld [vmem:[#allocation7 + $0x6c] ss:$16 sps:$4 sm:$0xff]   ;;  %v1845_v18 = vld [vmem:[#allocation7 + $0x84] ss:$16 sps:$4 sm:$0xff]   ;;  %v1846_v21 = vld [vmem:[#allocation7 + $0x88] ss:$16 sps:$4 sm:$0xff]  }
  0xc2   :  { %v1535_v23 = vsel %vm87_vm4, 1.0, %v2145_v1  ;;  %428 = vmatprep.subr.bf16.mxu0 %v1779_v20  ;;  %v1843_v20 = vld [vmem:[#allocation7 + $0x80] ss:$16 sps:$4 sm:$0xff]  }
  0xc3   :  { %v90_v26 = vpack.c.bf16 %v1535_v23, %v1535_v23  ;;  %v1854_v23 = vld [vmem:[#allocation7 + $0xac] ss:$16 sps:$4 sm:$0xff]  }
  0xc5   :  { %1733 = vmatmul.mubr.msk.bf16.vlgmr.msra.gmra.mrb[0].mxu1 %vm112_vm3, %v90_v26  ;;  %429 = vmatpush1.bf16.msra.mxu0 %v1777_v22  ;;  %v1851_v22 = vld [vmem:[#allocation7 + $0xa4] ss:$16 sps:$4 sm:$0xff]  }
  0xc6   :  { %468 = vmatpush1.bf16.msra.mxu1 %v1774_v24  ;;  %430 = vmatprep.subr.bf16.mxu0 %v1785_v25  ;;  %v1849_v24 = vld [vmem:[#allocation7 + $0xa0] ss:$16 sps:$4 sm:$0xff]   ;;  %v1852_v25 = vld [vmem:[#allocation7 + $0xa8] ss:$16 sps:$4 sm:$0xff]   ;;  %v1857_v26 = vld [vmem:[#allocation7 + $0xc4] ss:$16 sps:$4 sm:$0xff]  }
  0xc7   :  { %469 = vmatprep.subr.bf16.mxu1 %v1782_v27  ;;  %499 = vmatprep.mubr.bf16.mxu1 %v2144_v0  ;;  %v1860_v27 = vld [vmem:[#allocation7 + $0xcc] ss:$16 sps:$4 sm:$0xff]  }
  0xc9   :  { %431 = vmatpush1.bf16.msra.mxu0 %v1783_v28  ;;  %v1855_v28 = vld [vmem:[#allocation7 + $0xc0] ss:$16 sps:$4 sm:$0xff]  }
  0xca   :  { %470 = vmatpush1.bf16.msra.mxu1 %v1780_v29  ;;  %432 = vmatprep.subr.bf16.mxu0 %v1791_v30  ;;  %v1858_v29 = vld [vmem:[#allocation7 + $0xc8] ss:$16 sps:$4 sm:$0xff]   ;;  %v1863_v30 = vld [vmem:[#allocation7 + $0xe4] ss:$16 sps:$4 sm:$0xff]  }
  0xcb   :  { %471 = vmatprep.subr.bf16.mxu1 %v1788_v31  ;;  %v1866_v31 = vld [vmem:[#allocation7 + $0xec] ss:$16 sps:$4 sm:$0xff]  }
  0xcd   :  { %433 = vmatpush1.bf16.msra.mxu0 %v1789_v32  ;;  %v1861_v32 = vld [vmem:[#allocation7 + $0xe0] ss:$16 sps:$4 sm:$0xff]  }
  0xce   :  { %472 = vmatpush1.bf16.msra.mxu1 %v1786_v33  ;;  %434 = vmatprep.subr.bf16.mxu0 %v1797_v34  ;;  %v1864_v33 = vld [vmem:[#allocation7 + $0xe8] ss:$16 sps:$4 sm:$0xff]   ;;  %v1869_v34 = vld [vmem:[#allocation7 + $0x104] ss:$16 sps:$4 sm:$0xff]  }
  0xcf   :  { %473 = vmatprep.subr.bf16.mxu1 %v1794_v35  ;;  %v1872_v35 = vld [vmem:[#allocation7 + $0x10c] ss:$16 sps:$4 sm:$0xff]  }
  0xd1   :  { %435 = vmatpush1.bf16.msra.mxu0 %v1795_v36  ;;  %v1867_v36 = vld [vmem:[#allocation7 + $0x100] ss:$16 sps:$4 sm:$0xff]  }
  0xd2   :  { %474 = vmatpush1.bf16.msra.mxu1 %v1792_v37  ;;  %436 = vmatprep.subr.bf16.mxu0 %v1803_v40  ;;  %v1870_v37 = vld [vmem:[#allocation7 + $0x108] ss:$16 sps:$4 sm:$0xff]   ;;  %v1873_v40 = vld [vmem:[#allocation7 + $0x120] ss:$16 sps:$4 sm:$0xff]  }
  0xd3   :  { %475 = vmatprep.subr.bf16.mxu1 %v1800_v38  ;;  %v1875_v38 = vld [vmem:[#allocation7 + $0x124] ss:$16 sps:$4 sm:$0xff]  }
  0xd5   :  { %437 = vmatpush1.bf16.msra.mxu0 %v1801_v42  ;;  %v1881_v42 = vld [vmem:[#allocation7 + $0x144] ss:$16 sps:$4 sm:$0xff]  }
  0xd6   :  { %476 = vmatpush1.bf16.msra.mxu1 %v1798_v39  ;;  %438 = vmatprep.subr.bf16.mxu0 %v1809_v44  ;;  %v1878_v39 = vld [vmem:[#allocation7 + $0x12c] ss:$16 sps:$4 sm:$0xff]   ;;  %v1879_v44 = vld [vmem:[#allocation7 + $0x140] ss:$16 sps:$4 sm:$0xff]  }
  0xd7   :  { %477 = vmatprep.subr.bf16.mxu1 %v1806_v41  ;;  %v1876_v41 = vld [vmem:[#allocation7 + $0x128] ss:$16 sps:$4 sm:$0xff]  }
  0xd9   :  { %439 = vmatpush1.bf16.msra.mxu0 %v1807_v46  ;;  %v1887_v46 = vld [vmem:[#allocation7 + $0x164] ss:$16 sps:$4 sm:$0xff]  }
  0xda   :  { %478 = vmatpush1.bf16.msra.mxu1 %v1804_v43  ;;  %440 = vmatprep.subr.bf16.mxu0 %v1815_v48  ;;  %v1884_v43 = vld [vmem:[#allocation7 + $0x14c] ss:$16 sps:$4 sm:$0xff]   ;;  %v1885_v48 = vld [vmem:[#allocation7 + $0x160] ss:$16 sps:$4 sm:$0xff]  }
  0xdb   :  { %479 = vmatprep.subr.bf16.mxu1 %v1812_v45  ;;  %v1882_v45 = vld [vmem:[#allocation7 + $0x148] ss:$16 sps:$4 sm:$0xff]  }
  0xdd   :  { %441 = vmatpush1.bf16.msra.mxu0 %v1813_v50  ;;  %v1893_v50 = vld [vmem:[#allocation7 + $0x184] ss:$16 sps:$4 sm:$0xff]  }
  0xde   :  { %480 = vmatpush1.bf16.msra.mxu1 %v1810_v47  ;;  %1326 = vmatprep.subr.bf16.mxu0 %v1821_v52  ;;  %v1890_v47 = vld [vmem:[#allocation7 + $0x16c] ss:$16 sps:$4 sm:$0xff]   ;;  %v1891_v52 = vld [vmem:[#allocation7 + $0x180] ss:$16 sps:$4 sm:$0xff]  }
  0xdf   :  { %481 = vmatprep.subr.bf16.mxu1 %v1818_v49  ;;  %v1888_v49 = vld [vmem:[#allocation7 + $0x168] ss:$16 sps:$4 sm:$0xff]  }
  0xe2   :  { %482 = vmatpush1.bf16.msra.mxu1 %v1816_v51  ;;  %v1896_v51 = vld [vmem:[#allocation7 + $0x18c] ss:$16 sps:$4 sm:$0xff]  }
  0xe3   :  { %1408 = vmatprep.subr.bf16.mxu1 %v1824_v53  ;;  %v1894_v53 = vld [vmem:[#allocation7 + $0x188] ss:$16 sps:$4 sm:$0xff]  }
 0x193   :  { %v154_v54 = vpop.f32.mrb[0].mxu0 }
 0x194   :  { %v1722_v55 = vpop.f32.mrb[1].mxu0 }
 0x195   :  { %v157_v56 = vpop.f32.mrb[2].mxu0  ;;  %v1902_v55 = vld [vmem:[#allocation7 + $0x1ac] ss:$16 sps:$4 sm:$0xff]  }
 0x196   :  { %v1723_v57 = vpop.f32.mrb[3].mxu0  ;;  %v1897_v56 = vld [vmem:[#allocation7 + $0x1a0] ss:$16 sps:$4 sm:$0xff]  }
 0x197   :  { %v1900_v57 = vld [vmem:[#allocation7 + $0x1a8] ss:$16 sps:$4 sm:$0xff]  }
 0x198   :  { %v197_v58 = vpop.f32.mrb[0].mxu1 }
 0x199   :  { %v203_v60 = vsub.f32 %v197_v58, %v154_v54  ;;  %v1734_v61 = vpop.f32.mrb[1].mxu1  ;;  %v1905_v58 = vld [vmem:[#allocation7 + $0x1c4] ss:$16 sps:$4 sm:$0xff]  }
 0x19a   :  { %v200_v62 = vpop.f32.mrb[2].mxu1  ;;  %v1906_v61 = vld [vmem:[#allocation7 + $0x1c8] ss:$16 sps:$4 sm:$0xff]  }
 0x19b   :  { %v209_v63 = vmul.f32 %v207_v59, %v203_v60  ;;  %v1735_v0 = vpop.f32.mrb[3].mxu1  ;;  %v1908_v59 = vld [vmem:[#allocation7 + $0x1cc] ss:$16 sps:$4 sm:$0xff]   ;;  %v1903_v60 = vld [vmem:[#allocation7 + $0x1c0] ss:$16 sps:$4 sm:$0xff]  }
 0x19c   :  { %v1911_v62 = vld [vmem:[#allocation7 + $0x1e4] ss:$16 sps:$4 sm:$0xff]   ;;  %v1909_v0 = vld [vmem:[#allocation7 + $0x1e0] ss:$16 sps:$4 sm:$0xff]  }
 0x19d   :  { %v210_v1 = vadd.f32 %v209_v63, %v154_v54  ;;  %v1899_v54 = vld [vmem:[#allocation7 + $0x1a4] ss:$16 sps:$4 sm:$0xff]   ;;  %v1914_v63 = vld [vmem:[#allocation7 + $0x1ec] ss:$16 sps:$4 sm:$0xff]  }
 0x19f   :  { %v211_v4 = vpack.c.bf16 %v210_v1, %v210_v1  ;;  %v1912_v1 = vld [vmem:[#allocation7 + $0x1e8] ss:$16 sps:$4 sm:$0xff]  }
 0x1a1   :  { %459 = vmatmul.mubr.bf16.vlgmr.msra.gmra.mrb[4].mxu0 %v211_v4  ;;  %500 = vmatmul.mubr.bf16.vlgmr.msra.gmra.mrb[4].mxu1 %v211_v4  ;;  %v2237_v4 = vshrl.u32 %v75_v14, 7 }
 0x1a2   :  { %1327 = vmatpush1.bf16.msra.mxu0 %v1819_v2  ;;  %1409 = vmatpush1.bf16.msra.mxu1 %v1822_v3  ;;  %v1917_v2 = vld [vmem:[#allocation7 + $0x204] ss:$16 sps:$4 sm:$0xff]   ;;  %v1920_v3 = vld [vmem:[#allocation7 + $0x20c] ss:$16 sps:$4 sm:$0xff]  }
 0x1a3   :  { %1328 = vmatprep.subr.bf16.mxu0 %v1827_v5  ;;  %1410 = vmatprep.subr.bf16.mxu1 %v1830_v6  ;;  %v248_v5 = vsub.s32 0, %v2237_v4  ;;  %v2243_v6 = vld [vmem:[%s2293_s3] sm:$0xf] }
 0x1a6   :  { %1329 = vmatpush1.bf16.msra.mxu0 %v1825_v7  ;;  %1411 = vmatpush1.bf16.msra.mxu1 %v1828_v8  ;;  %v252_v7 = vsub.s32 1, %v2237_v4  ;;  %v260_v8 = vsub.s32 3, %v2237_v4 }
 0x1a7   :  { %1330 = vmatprep.subr.bf16.mxu0 %v1833_v9  ;;  %1412 = vmatprep.subr.bf16.mxu1 %v1836_v10  ;;  %v249_v9 = vrot.slane %v2243_v6, %v248_v5 }
 0x1a8   :  { %v253_v14 = vrot.slane %v2243_v6, %v252_v7  ;;  %v261_v10 = vrot.slane %v2243_v6, %v260_v8 }
 0x1aa   :  { %1331 = vmatpush1.bf16.msra.mxu0 %v1831_v11  ;;  %1413 = vmatpush1.bf16.msra.mxu1 %v1834_v12 }
 0x1ab   :  { %1332 = vmatprep.subr.bf16.mxu0 %v1839_v13  ;;  %1414 = vmatprep.subr.bf16.mxu1 %v1842_v15 }
 0x1ae   :  { %1333 = vmatpush1.bf16.msra.mxu0 %v1837_v16  ;;  %1415 = vmatpush1.bf16.msra.mxu1 %v1840_v17 }
 0x1af   :  { %1334 = vmatprep.subr.bf16.mxu0 %v1845_v18  ;;  %1416 = vmatprep.subr.bf16.mxu1 %v1848_v19 }
 0x1b2   :  { %1335 = vmatpush1.bf16.msra.mxu0 %v1843_v20  ;;  %1417 = vmatpush1.bf16.msra.mxu1 %v1846_v21 }
 0x1b3   :  { %1336 = vmatprep.subr.bf16.mxu0 %v1851_v22  ;;  %1418 = vmatprep.subr.bf16.mxu1 %v1854_v23 }
 0x1b6   :  { %1337 = vmatpush1.bf16.msra.mxu0 %v1849_v24  ;;  %1419 = vmatpush1.bf16.msra.mxu1 %v1852_v25 }
 0x1b7   :  { %1338 = vmatprep.subr.bf16.mxu0 %v1857_v26  ;;  %1420 = vmatprep.subr.bf16.mxu1 %v1860_v27 }
 0x1ba   :  { %1339 = vmatpush1.bf16.msra.mxu0 %v1855_v28  ;;  %1421 = vmatpush1.bf16.msra.mxu1 %v1858_v29 }
 0x1bb   :  { %1340 = vmatprep.subr.bf16.mxu0 %v1863_v30  ;;  %1422 = vmatprep.subr.bf16.mxu1 %v1866_v31 }
 0x1be   :  { %1341 = vmatpush1.bf16.msra.mxu0 %v1861_v32  ;;  %1423 = vmatpush1.bf16.msra.mxu1 %v1864_v33 }
 0x1bf   :  { %1342 = vmatprep.subr.bf16.mxu0 %v1869_v34  ;;  %1424 = vmatprep.subr.bf16.mxu1 %v1872_v35 }
 0x1c2   :  { %1343 = vmatpush1.bf16.msra.mxu0 %v1867_v36  ;;  %1425 = vmatpush1.bf16.msra.mxu1 %v1870_v37 }
 0x1c3   :  { %1344 = vmatprep.subr.bf16.mxu0 %v1875_v38  ;;  %1426 = vmatprep.subr.bf16.mxu1 %v1878_v39 }
 0x1c6   :  { %1345 = vmatpush1.bf16.msra.mxu0 %v1873_v40  ;;  %1427 = vmatpush1.bf16.msra.mxu1 %v1876_v41 }
 0x1c7   :  { %1346 = vmatprep.subr.bf16.mxu0 %v1881_v42  ;;  %1428 = vmatprep.subr.bf16.mxu1 %v1884_v43  ;;  %v1915_v42 = vld [vmem:[#allocation7 + $0x200] ss:$16 sps:$4 sm:$0xff]   ;;  %v1918_v43 = vld [vmem:[#allocation7 + $0x208] ss:$16 sps:$4 sm:$0xff]  }
 0x1ca   :  { %1347 = vmatpush1.bf16.msra.mxu0 %v1879_v44  ;;  %1429 = vmatpush1.bf16.msra.mxu1 %v1882_v45  ;;  %v1923_v45 = vld [vmem:[#allocation7 + $0x224] ss:$16 sps:$4 sm:$0xff]  }
 0x1cb   :  { %1348 = vmatprep.subr.bf16.mxu0 %v1887_v46  ;;  %1430 = vmatprep.subr.bf16.mxu1 %v1890_v47  ;;  %v1926_v46 = vld [vmem:[#allocation7 + $0x22c] ss:$16 sps:$4 sm:$0xff]  }
 0x1ce   :  { %1349 = vmatpush1.bf16.msra.mxu0 %v1885_v48  ;;  %1431 = vmatpush1.bf16.msra.mxu1 %v1888_v49  ;;  %v1921_v48 = vld [vmem:[#allocation7 + $0x220] ss:$16 sps:$4 sm:$0xff]   ;;  %v1924_v49 = vld [vmem:[#allocation7 + $0x228] ss:$16 sps:$4 sm:$0xff]  }
 0x1cf   :  { %1350 = vmatprep.subr.bf16.mxu0 %v1893_v50  ;;  %1432 = vmatprep.subr.bf16.mxu1 %v1896_v51  ;;  %v1929_v50 = vld [vmem:[#allocation7 + $0x244] ss:$16 sps:$4 sm:$0xff]   ;;  %v1932_v51 = vld [vmem:[#allocation7 + $0x24c] ss:$16 sps:$4 sm:$0xff]  }
 0x1d2   :  { %1351 = vmatpush1.bf16.msra.mxu0 %v1891_v52  ;;  %1433 = vmatpush1.bf16.msra.mxu1 %v1894_v53  ;;  %v1927_v52 = vld [vmem:[#allocation7 + $0x240] ss:$16 sps:$4 sm:$0xff]   ;;  %v1930_v53 = vld [vmem:[#allocation7 + $0x248] ss:$16 sps:$4 sm:$0xff]  }
 0x1d3   :  { %1352 = vmatprep.subr.bf16.mxu0 %v1899_v54  ;;  %1434 = vmatprep.subr.bf16.mxu1 %v1902_v55  ;;  %v1935_v54 = vld [vmem:[#allocation7 + $0x264] ss:$16 sps:$4 sm:$0xff]   ;;  %v1938_v55 = vld [vmem:[#allocation7 + $0x26c] ss:$16 sps:$4 sm:$0xff]  }
 0x1d6   :  { %1353 = vmatpush1.bf16.msra.mxu0 %v1897_v56  ;;  %1435 = vmatpush1.bf16.msra.mxu1 %v1900_v57  ;;  %v256_v56 = vsub.s32 2, %v2237_v4  ;;  %v1933_v57 = vld [vmem:[#allocation7 + $0x260] ss:$16 sps:$4 sm:$0xff]  }
 0x1d7   :  { %1354 = vmatprep.subr.bf16.mxu0 %v1905_v58  ;;  %1436 = vmatprep.subr.bf16.mxu1 %v1908_v59  ;;  %v1936_v58 = vld [vmem:[#allocation7 + $0x268] ss:$16 sps:$4 sm:$0xff]   ;;  %v1941_v59 = vld [vmem:[#allocation7 + $0x284] ss:$16 sps:$4 sm:$0xff]  }
 0x1da   :  { %1355 = vmatpush1.bf16.msra.mxu0 %v1903_v60  ;;  %1437 = vmatpush1.bf16.msra.mxu1 %v1906_v61  ;;  %v1944_v60 = vld [vmem:[#allocation7 + $0x28c] ss:$16 sps:$4 sm:$0xff]   ;;  %v257_v61 = vrot.slane %v2243_v6, %v256_v56 }
 0x1db   :  { %1356 = vmatprep.subr.bf16.mxu0 %v1911_v62  ;;  %1438 = vmatprep.subr.bf16.mxu1 %v1914_v63  ;;  %v1939_v62 = vld [vmem:[#allocation7 + $0x280] ss:$16 sps:$4 sm:$0xff]   ;;  %v1942_v63 = vld [vmem:[#allocation7 + $0x288] ss:$16 sps:$4 sm:$0xff]  }
 0x1de   :  { %1357 = vmatpush1.bf16.msra.mxu0 %v1909_v0  ;;  %1439 = vmatpush1.bf16.msra.mxu1 %v1912_v1  ;;  %v1947_v0 = vld [vmem:[#allocation7 + $0x2a4] ss:$16 sps:$4 sm:$0xff]   ;;  %v1950_v1 = vld [vmem:[#allocation7 + $0x2ac] ss:$16 sps:$4 sm:$0xff]  }
 0x1df   :  { %1367 = vmatprep.subr.bf16.mxu0 %v1917_v2  ;;  %1449 = vmatprep.subr.bf16.mxu1 %v1920_v3  ;;  %v1945_v3 = vld [vmem:[#allocation7 + $0x2a0] ss:$16 sps:$4 sm:$0xff]  }
 0x274   :  { %v460_v11 = vpop.f32.mrb[4].mxu0  ;;  %v2256_v12 = vpop.f32.mrb[4].mxu1 }
 0x275   :  { %v461_v13 = vadd.f32 %v460_v11, %v249_v9  ;;  %v462_v15 = vpop.f32.mrb[5].mxu0  ;;  %v503_v16 = vpop.f32.mrb[5].mxu1  ;;  %v2263_v2 = vadd.f32 %v2256_v12, %v257_v61  ;;  %v1948_v9 = vld [vmem:[#allocation7 + $0x2a8] ss:$16 sps:$4 sm:$0xff]   ;;  %v1951_v11 = vld [vmem:[#allocation7 + $0x2c0] ss:$16 sps:$4 sm:$0xff]  }
 0x276   :  { %v463_v17 = vadd.f32 %v462_v15, %v253_v14  ;;  %v504_v18 = vadd.f32 %v503_v16, %v261_v10  ;;  %v464_v19 = vpop.f32.mrb[6].mxu0  ;;  %v505_v20 = vpop.f32.mrb[6].mxu1  ;;  %v1953_v14 = vld [vmem:[#allocation7 + $0x2c4] ss:$16 sps:$4 sm:$0xff]   ;;  %v1956_v10 = vld [vmem:[#allocation7 + $0x2cc] ss:$16 sps:$4 sm:$0xff]  }
 0x277   :  { %v508_v21 = vsub.f32 0.0, %v461_v13  ;;  %v465_v22 = vpop.f32.mrb[7].mxu0  ;;  %v506_v23 = vpop.f32.mrb[7].mxu1  ;;  %v510_v6 = vsub.f32 0.0, %v2263_v2  ;;  %v1959_v15 = vld [vmem:[#allocation7 + $0x2e4] ss:$16 sps:$4 sm:$0xff]  }
 0x278   :  { %v509_v24 = vsub.f32 0.0, %v463_v17  ;;  %v511_v25 = vsub.f32 0.0, %v504_v18  ;;  %v1962_v16 = vld [vmem:[#allocation7 + $0x2ec] ss:$16 sps:$4 sm:$0xff]   ;;  %v1965_v19 = vld [vmem:[#allocation7 + $0x304] ss:$16 sps:$4 sm:$0xff]  }
 0x279   :  { %v512_v26 = vmul.f32 1.442695, %v508_v21  ;;  %v516_v12 = vmul.f32 1.442695, %v510_v6  ;;  %v1968_v20 = vld [vmem:[#allocation7 + $0x30c] ss:$16 sps:$4 sm:$0xff]  }
 0x27a   :  { %v514_v27 = vmul.f32 1.442695, %v509_v24  ;;  %v518_v28 = vmul.f32 1.442695, %v511_v25  ;;  %v1963_v21 = vld [vmem:[#allocation7 + $0x300] ss:$16 sps:$4 sm:$0xff]  }
 0x27b   :  { %2011 = vpow2.f32 %v512_v26  ;;  %v1966_v22 = vld [vmem:[#allocation7 + $0x308] ss:$16 sps:$4 sm:$0xff]   ;;  %v1971_v23 = vld [vmem:[#allocation7 + $0x324] ss:$16 sps:$4 sm:$0xff]   ;;  %v1974_v24 = vld [vmem:[#allocation7 + $0x32c] ss:$16 sps:$4 sm:$0xff]  }
 0x27c   :  { %2013 = vpow2.f32 %v514_v27  ;;  %v1969_v25 = vld [vmem:[#allocation7 + $0x320] ss:$16 sps:$4 sm:$0xff]   ;;  %v1972_v26 = vld [vmem:[#allocation7 + $0x328] ss:$16 sps:$4 sm:$0xff]   ;;  %v1977_v27 = vld [vmem:[#allocation7 + $0x344] ss:$16 sps:$4 sm:$0xff]  }
 0x27d   :  { %2015 = vpow2.f32 %v518_v28  ;;  %v1980_v28 = vld [vmem:[#allocation7 + $0x34c] ss:$16 sps:$4 sm:$0xff]  }
 0x285   :  { %v2012_v29 = vpop.eup %2011 }
 0x286   :  { %v520_v30 = vadd.f32 1.0, %v2012_v29  ;;  %v2014_v31 = vpop.eup %2013  ;;  %v1975_v29 = vld [vmem:[#allocation7 + $0x340] ss:$16 sps:$4 sm:$0xff]  }
 0x287   :  { %v2016_v32 = vpop.eup %2015  ;;  %v521_v33 = vadd.f32 1.0, %v2014_v31 }
 0x288   :  { %2017 = vrcp.f32 %v520_v30  ;;  %v523_v34 = vadd.f32 1.0, %v2016_v32  ;;  %v1978_v30 = vld [vmem:[#allocation7 + $0x348] ss:$16 sps:$4 sm:$0xff]   ;;  %v1983_v32 = vld [vmem:[#allocation7 + $0x364] ss:$16 sps:$4 sm:$0xff]  }
 0x289   :  { %2019 = vrcp.f32 %v521_v33  ;;  %v1986_v33 = vld [vmem:[#allocation7 + $0x36c] ss:$16 sps:$4 sm:$0xff]  }
 0x28a   :  { %2021 = vrcp.f32 %v523_v34 }
 0x28b   :  { %2023 = vpow2.f32 %v516_v12 }
 0x292   :  { %v2018_v35 = vpop.eup %2017 }
 0x293   :  { %v2020_v36 = vpop.eup %2019  ;;  %v528_v37 = vmul.f32 %v2018_v35, %v461_v13  ;;  %v1954_v13 = vld [vmem:[#allocation7 + $0x2c8] ss:$16 sps:$4 sm:$0xff]   ;;  %v1981_v35 = vld [vmem:[#allocation7 + $0x360] ss:$16 sps:$4 sm:$0xff]  }
 0x294   :  { %v2022_v38 = vpop.eup %2021  ;;  %v529_v39 = vmul.f32 %v2020_v36, %v463_v17  ;;  %v1957_v17 = vld [vmem:[#allocation7 + $0x2e0] ss:$16 sps:$4 sm:$0xff]   ;;  %v1984_v36 = vld [vmem:[#allocation7 + $0x368] ss:$16 sps:$4 sm:$0xff]  }
 0x295   :  { %v531_v40 = vmul.f32 %v2022_v38, %v504_v18  ;;  %v532_v44 = vpack.c.bf16 %v528_v37, %v528_v37  ;;  %v1960_v18 = vld [vmem:[#allocation7 + $0x2e8] ss:$16 sps:$4 sm:$0xff]   ;;  %v2024_v31 = vpop.eup %2023  ;;  %v1989_v37 = vld [vmem:[#allocation7 + $0x384] ss:$16 sps:$4 sm:$0xff]   ;;  %v1992_v38 = vld [vmem:[#allocation7 + $0x38c] ss:$16 sps:$4 sm:$0xff]  }
 0x296   :  { %v533_v41 = vpack.c.bf16 %v529_v39, %v529_v39  ;;  %v522_v34 = vadd.f32 1.0, %v2024_v31  ;;  %v1987_v39 = vld [vmem:[#allocation7 + $0x380] ss:$16 sps:$4 sm:$0xff]  }
 0x297   :  { %v535_v47 = vpack.c.bf16 %v531_v40, %v531_v40  ;;  %v1990_v40 = vld [vmem:[#allocation7 + $0x388] ss:$16 sps:$4 sm:$0xff]  }
 0x298   :  { %1358 = vmatprep.mubr.bf16.mxu0 %v533_v41  ;;  %1440 = vmatprep.mubr.bf16.mxu1 %v533_v41  ;;  %2025 = vrcp.f32 %v522_v34  ;;  %v1995_v41 = vld [vmem:[#allocation7 + $0x3a4] ss:$16 sps:$4 sm:$0xff]  }
 0x299   :  { %1359 = vmatmul.mubr.bf16.vlgmr.msra.gmra.mrb[8].mxu0 %v532_v44  ;;  %1441 = vmatmul.mubr.bf16.vlgmr.msra.gmra.mrb[8].mxu1 %v532_v44  ;;  %v1996_v44 = vld [vmem:[#allocation7 + $0x3a8] ss:$16 sps:$4 sm:$0xff]  }
 0x29a   :  { %1368 = vmatpush1.bf16.msra.mxu0 %v1915_v42  ;;  %1450 = vmatpush1.bf16.msra.mxu1 %v1918_v43  ;;  %v1998_v42 = vld [vmem:[#allocation7 + $0x3ac] ss:$16 sps:$4 sm:$0xff]   ;;  %v1993_v43 = vld [vmem:[#allocation7 + $0x3a0] ss:$16 sps:$4 sm:$0xff]  }
 0x29b   :  { %1399 = vmatprep.mubr.bf16.mxu0 %v535_v47  ;;  %1481 = vmatprep.mubr.bf16.mxu1 %v535_v47  ;;  %v1999_v47 = vld [vmem:[#allocation7 + $0x3c0] ss:$16 sps:$4 sm:$0xff]  }
 0x29c   :  { %1369 = vmatprep.subr.bf16.mxu0 %v1923_v45  ;;  %1451 = vmatprep.subr.bf16.mxu1 %v1926_v46  ;;  %v2001_v45 = vld [vmem:[#allocation7 + $0x3c4] ss:$16 sps:$4 sm:$0xff]   ;;  %v2004_v46 = vld [vmem:[#allocation7 + $0x3cc] ss:$16 sps:$4 sm:$0xff]  }
 0x29e   :  { %1370 = vmatpush1.bf16.msra.mxu0 %v1921_v48  ;;  %1452 = vmatpush1.bf16.msra.mxu1 %v1924_v49  ;;  %v2002_v48 = vld [vmem:[#allocation7 + $0x3c8] ss:$16 sps:$4 sm:$0xff]   ;;  %v2007_v49 = vld [vmem:[#allocation7 + $0x3e4] ss:$16 sps:$4 sm:$0xff]  }
 0x29f   :  { %1371 = vmatprep.subr.bf16.mxu0 %v1929_v50  ;;  %1453 = vmatprep.subr.bf16.mxu1 %v1932_v51  ;;  %v2010_v50 = vld [vmem:[#allocation7 + $0x3ec] ss:$16 sps:$4 sm:$0xff]  }
 0x2a2   :  { %1372 = vmatpush1.bf16.msra.mxu0 %v1927_v52  ;;  %1454 = vmatpush1.bf16.msra.mxu1 %v1930_v53  ;;  %v2026_v51 = vpop.eup %2025  ;;  %v2005_v52 = vld [vmem:[#allocation7 + $0x3e0] ss:$16 sps:$4 sm:$0xff]   ;;  %v2008_v53 = vld [vmem:[#allocation7 + $0x3e8] ss:$16 sps:$4 sm:$0xff]  }
 0x2a3   :  { %1373 = vmatprep.subr.bf16.mxu0 %v1935_v54  ;;  %1455 = vmatprep.subr.bf16.mxu1 %v1938_v55  ;;  %v530_v54 = vmul.f32 %v2026_v51, %v2263_v2 }
 0x2a5   :  { %v534_v55 = vpack.c.bf16 %v530_v54, %v530_v54 }
 0x2a6   :  { %1374 = vmatpush1.bf16.msra.mxu0 %v1933_v57  ;;  %1456 = vmatpush1.bf16.msra.mxu1 %v1936_v58  ;;  %v664_v57 = vld [vmem:[%s2295_s5] sm:$0xf]  ;;  %s2149_s5 = smov [#allocation8]  }
 0x2a7   :  { %1375 = vmatprep.subr.bf16.mxu0 %v1941_v59  ;;  %1457 = vmatprep.subr.bf16.mxu1 %v1944_v60  ;;  %v669_v58 = vrot.slane %v664_v57, %v248_v5  ;;  %v677_v59 = vrot.slane %v664_v57, %v256_v56  ;;  %v673_v60 = vrot.slane %v664_v57, %v252_v7  ;;  %s1524_s8 = sshll.u32 %s2149_s5, 4  ;;  %s1525_s8 = int_to_ptr.vmem [resolvable:$true] %s1524_s8 }
 0x2a8   :  { %v681_v61 = vrot.slane %v664_v57, %v260_v8  ;;  %s2109_s15 = scalar_lea.vmem %s1525_s8, 512  ;;  %p2114_p11 = scmp.lt.s32.totalorder %s1525_s8, %s1525_s8 }
 0x2a9   :  { %p2110_p10 = scmp.ne.s32.totalorder %s1525_s8, %s2109_s15  ;;  %p2115_p12 = scmp.lt.s32.totalorder %s2109_s15, %s2109_s15 }
 0x2aa   :  { %1376 = vmatpush1.bf16.msra.mxu0 %v1939_v62  ;;  %1458 = vmatpush1.bf16.msra.mxu1 %v1942_v63 }
 0x2ab   :  { %1377 = vmatprep.subr.bf16.mxu0 %v1947_v0  ;;  %1459 = vmatprep.subr.bf16.mxu1 %v1950_v1  ;;  %p2116_p13 = por %p2115_p12, %p2114_p11 }
 0x2ad   :  { %p2117_p0 = pnand %p2116_p13, %p2110_p10 }
 0x2ae   :  { %1378 = vmatpush1.bf16.msra.mxu0 %v1945_v3  ;;  %1460 = vmatpush1.bf16.msra.mxu1 %v1948_v9 }
 0x2af   :  { %1379 = vmatprep.subr.bf16.mxu0 %v1953_v14  ;;  %1461 = vmatprep.subr.bf16.mxu1 %v1956_v10 }
 0x2b2   :  { %1380 = vmatpush1.bf16.msra.mxu0 %v1951_v11  ;;  %1462 = vmatpush1.bf16.msra.mxu1 %v1954_v13 }
 0x2b3   :  { %1381 = vmatprep.subr.bf16.mxu0 %v1959_v15  ;;  %1463 = vmatprep.subr.bf16.mxu1 %v1962_v16 }
 0x2b6   :  { %1382 = vmatpush1.bf16.msra.mxu0 %v1957_v17  ;;  %1464 = vmatpush1.bf16.msra.mxu1 %v1960_v18 }
 0x2b7   :  { %1383 = vmatprep.subr.bf16.mxu0 %v1965_v19  ;;  %1465 = vmatprep.subr.bf16.mxu1 %v1968_v20 }
 0x2ba   :  { %1384 = vmatpush1.bf16.msra.mxu0 %v1963_v21  ;;  %1466 = vmatpush1.bf16.msra.mxu1 %v1966_v22 }
 0x2bb   :  { %1385 = vmatprep.subr.bf16.mxu0 %v1971_v23  ;;  %1467 = vmatprep.subr.bf16.mxu1 %v1974_v24 }
 0x2be   :  { %1386 = vmatpush1.bf16.msra.mxu0 %v1969_v25  ;;  %1468 = vmatpush1.bf16.msra.mxu1 %v1972_v26 }
 0x2bf   :  { %1387 = vmatprep.subr.bf16.mxu0 %v1977_v27  ;;  %1469 = vmatprep.subr.bf16.mxu1 %v1980_v28 }
 0x2c2   :  { %1388 = vmatpush1.bf16.msra.mxu0 %v1975_v29  ;;  %1470 = vmatpush1.bf16.msra.mxu1 %v1978_v30 }
 0x2c3   :  { %1389 = vmatprep.subr.bf16.mxu0 %v1983_v32  ;;  %1471 = vmatprep.subr.bf16.mxu1 %v1986_v33 }
 0x2c6   :  { %1390 = vmatpush1.bf16.msra.mxu0 %v1981_v35  ;;  %1472 = vmatpush1.bf16.msra.mxu1 %v1984_v36 }
 0x2c7   :  { %1391 = vmatprep.subr.bf16.mxu0 %v1989_v37  ;;  %1473 = vmatprep.subr.bf16.mxu1 %v1992_v38 }
 0x2ca   :  { %1392 = vmatpush1.bf16.msra.mxu0 %v1987_v39  ;;  %1474 = vmatpush1.bf16.msra.mxu1 %v1990_v40 }
 0x2cb   :  { %1393 = vmatprep.subr.bf16.mxu0 %v1995_v41  ;;  %1475 = vmatprep.subr.bf16.mxu1 %v1998_v42 }
 0x2ce   :  { %1394 = vmatpush1.bf16.msra.mxu0 %v1993_v43  ;;  %1476 = vmatpush1.bf16.msra.mxu1 %v1996_v44 }
 0x2cf   :  { %1395 = vmatprep.subr.bf16.mxu0 %v2001_v45  ;;  %1477 = vmatprep.subr.bf16.mxu1 %v2004_v46 }
 0x2d2   :  { %1396 = vmatpush1.bf16.msra.mxu0 %v1999_v47  ;;  %1478 = vmatpush1.bf16.msra.mxu1 %v2002_v48 }
 0x2d3   :  { %1397 = vmatprep.subr.bf16.mxu0 %v2007_v49  ;;  %1479 = vmatprep.subr.bf16.mxu1 %v2010_v50 }
 0x2d6   :  { %1398 = vmatpush1.bf16.msra.mxu0 %v2005_v52  ;;  %1480 = vmatpush1.bf16.msra.mxu1 %v2008_v53 }
 0x2d9   :  { %1400 = vmatmul.mubr.bf16.vlgmr.msra.gmra.mrb[8].mxu0 %v534_v55  ;;  %1482 = vmatmul.mubr.bf16.vlgmr.msra.gmra.mrb[8].mxu1 %v534_v55 }
 0x3ac   :  { %v1401_v62 = vpop.f32.mrb[8].mxu0  ;;  %v1483_v63 = vpop.f32.mrb[8].mxu1 }
 0x3ad   :  { %v1736_v0 = vadd.f32 %v1401_v62, %v669_v58  ;;  %v1738_v1 = vadd.f32 %v1483_v63, %v677_v59  ;;  %v1403_v2 = vpop.f32.mrb[9].mxu0  ;;  %v1485_v3 = vpop.f32.mrb[9].mxu1 }
 0x3ae   :  { %v1737_v9 = vadd.f32 %v1403_v2, %v673_v60  ;;  %v1739_v14 = vadd.f32 %v1485_v3, %v681_v61  ;;  %v1405_v10 = vpop.f32.mrb[10].mxu0  ;;  %v1487_v6 = vpop.f32.mrb[10].mxu1 }
 0x3af   :  { %v1490_v5 = vsub.f32 0.0, %v1736_v0  ;;  %v1492_v11 = vsub.f32 0.0, %v1738_v1  ;;  %v1406_v13 = vpop.f32.mrb[11].mxu0  ;;  %v1488_v56 = vpop.f32.mrb[11].mxu1 }
 0x3b0   :  { %v1491_v15 = vsub.f32 0.0, %v1737_v9  ;;  %v1493_v16 = vsub.f32 0.0, %v1739_v14 }
 0x3b1   :  { %v1494_v7 = vmul.f32 1.442695, %v1490_v5  ;;  %v1498_v12 = vmul.f32 1.442695, %v1492_v11 }
 0x3b2   :  { %v1496_v4 = vmul.f32 1.442695, %v1491_v15  ;;  %v1500_v8 = vmul.f32 1.442695, %v1493_v16 }
 0x3b3   :  { %2027 = vpow2.f32 %v1494_v7 }
 0x3b4   :  { %2029 = vpow2.f32 %v1498_v12 }
 0x3b5   :  { %2031 = vpow2.f32 %v1496_v4 }
 0x3b6   :  { %2033 = vpow2.f32 %v1500_v8 }
 0x3bd   :  { %v2028_v17 = vpop.eup %2027 }
 0x3be   :  { %v2030_v18 = vpop.eup %2029  ;;  %v1502_v19 = vadd.f32 1.0, %v2028_v17 }
 0x3bf   :  { %v2032_v20 = vpop.eup %2031  ;;  %v1504_v21 = vadd.f32 1.0, %v2030_v18 }
 0x3c0   :  { %v2034_v22 = vpop.eup %2033  ;;  %2035 = vrcp.f32 %v1502_v19  ;;  %v1503_v23 = vadd.f32 1.0, %v2032_v20 }
 0x3c1   :  { %2037 = vrcp.f32 %v1504_v21  ;;  %v1505_v24 = vadd.f32 1.0, %v2034_v22 }
 0x3c2   :  { %2039 = vrcp.f32 %v1503_v23 }
 0x3c3   :  { %2041 = vrcp.f32 %v1505_v24 }
 0x3ca   :  { %v2036_v25 = vpop.eup %2035 }
 0x3cb   :  { %v2038_v26 = vpop.eup %2037  ;;  %v1510_v27 = vmul.f32 %v2036_v25, %v1736_v0 }
 0x3cc   :  { %v2040_v28 = vpop.eup %2039  ;;  %v1512_v29 = vmul.f32 %v2038_v26, %v1738_v1 }
 0x3cd   :  { %v2042_v30 = vpop.eup %2041  ;;  %1514 = vst [vmem:[#allocation8] sm:$0xff] %v1510_v27  ;;  %v1511_v31 = vmul.f32 %v2040_v28, %v1737_v9 }
 0x3ce   :  { %1516 = vst [vmem:[#allocation8 + $0x10] sm:$0xff] %v1512_v29  ;;  %v1513_v32 = vmul.f32 %v2042_v30, %v1739_v14 }
 0x3cf   :  { %1515 = vst [vmem:[#allocation8 + $0x8] sm:$0xff] %v1511_v31 }
 0x3d0   :  { %1517 = vst [vmem:[#allocation8 + $0x18] sm:$0xff] %v1513_v32 }
 0x3d1   :  { %2120 = shalt.err (!%p2117_p0)
}
 0x3d2   :  { %s2121_s18 = scalar_lea.hbm %s2296_s6, 512 }
 0x3d3   :  { %p2122_p1 = scmp.ne.s32.totalorder %s2296_s6, %s2121_s18  ;;  %p2125_p2 = scmp.lt.u32.totalorder %s2121_s18, %s2296_s6 }
 0x3d5   :  { %p2127_p3 = pnand %p2125_p2, %p2122_p1 }
 0x3d7   :  { %2130 = shalt.err (!%p2127_p3)
}
 0x3d8   :  { %1527 = dma.vmem_to_hbm [thread:$0]  %s1525_s8, 512, %s2296_s6, [#allocation4]  }
 0x3d9   :  { %2135 = dma.done.wait [#allocation4], 512  }
 0x3da   :  { %2136 = vsyncadd [#allocation4], 4294966784 }
 0x3db   :  { %1531 = vsyncpa [#allocation3], 1 }
 0x3dc   :  { %1532 = vsyncpa [#allocation6], 1 }
 0x3dd   :  { %1533 = vsyncpa [#allocation4], 1 }

</bundles_post_ra>
